<compile_context>
chip_gen: v7x
topology: tpu7x:2x2x1
jax: 0.10.0
libtpu: 0.0.40
codegen_flags: <defaults>
</compile_context>

<pallas_src>
import jax
import jax.numpy as jnp
from jax.experimental import pallas as pl
from jax.experimental.pallas import tpu as pltpu

BN_EPS = 1e-5

# ---------------------------------------------------------------------------
# Synthetic DAG (what construct_NN_graph / cal_term_dim would have produced).
# ---------------------------------------------------------------------------
LAYERS_DELETE = ["in1", "in2"]
TERM_DIM_MAP = {"in1": 8, "in2": 8, "A": 16, "B": 8, "final": 8}
TERM_NEIGHBOR_MAP = {"A": ["in1", "in2"], "B": ["in1"], "final": ["A", "B"]}
TERM_LAYER_LIST = [["A", "B"], ["final"]]
INPUT_DIM = sum(TERM_DIM_MAP[e] for e in LAYERS_DELETE)          # 16

# ---------------------------------------------------------------------------
# Packed layout constants.
# ---------------------------------------------------------------------------
LANE = 128                                   # lane-dense padding for aux head
BATCH = 8                                    # batch size; also the replication
                                             # factor of the vector rows in the slab
L0_TERMS = TERM_LAYER_LIST[0]                # ["A", "B"]
L0_WIDTH = sum(TERM_DIM_MAP[t] for t in L0_TERMS)                # 24
FINAL_HIDDEN = TERM_DIM_MAP["final"]                             # 8

W0_ROWS = (0, INPUT_DIM)                                         # (0, 16)
WF_ROWS = (INPUT_DIM, INPUT_DIM + L0_WIDTH)                      # (16, 40)
WA_ROWS = (WF_ROWS[1], WF_ROWS[1] + FINAL_HIDDEN)                # (40, 48)

# bias/gamma/beta vectors, each replicated BATCH rows, appended under weights
_VEC_NAMES = ("b0", "g0", "be0", "bf", "gf", "bef", "ba", "ga", "bea")
VEC_ROW = {n: WA_ROWS[1] + i * BATCH for i, n in enumerate(_VEC_NAMES)}
SLAB_ROWS = WA_ROWS[1] + len(_VEC_NAMES) * BATCH                 # 120 (mult of 8)

# column range of each input (deleted) term inside x
_in_off = {}
_o = 0
for _e in LAYERS_DELETE:
    _in_off[_e] = (_o, _o + TERM_DIM_MAP[_e])
    _o += TERM_DIM_MAP[_e]

# column range of each layer-0 term inside the packed hidden h0
_l0_col = {}
_c = 0
for _t in L0_TERMS:
    _l0_col[_t] = (_c, _c + TERM_DIM_MAP[_t])
    _c += TERM_DIM_MAP[_t]


# ---------------------------------------------------------------------------
# Fused Pallas kernel: the whole DAG in one call.
# ---------------------------------------------------------------------------
def _bn_train(h, g, be):
    """Training-mode BatchNorm1d; g/be already materialized as (batch, N)."""
    mu = jnp.mean(h, axis=0, keepdims=True)
    xc = h - mu
    var = jnp.mean(xc * xc, axis=0, keepdims=True)
    return xc * jax.lax.rsqrt(var + BN_EPS) * g + be      # rsqrt on EUP


def _fused_dag_kernel(x_ref, slab_ref, out_ref):
    x = x_ref[...]            # (batch, 16)
    s = slab_ref[...]         # (120, 128) packed weight + replicated vector slab

    def vec(name, width=LANE):
        # batch-replicated bias/gamma/beta block: plain (batch, width) slice,
        # no sublane broadcast on the critical path.
        r = VEC_ROW[name]
        return s[r:r + BATCH, 0:width]

    # layer 0: terms A and B as ONE packed matmul; hn0 == concat(A_out, B_out)
    w0 = s[W0_ROWS[0]:W0_ROWS[1], 0:L0_WIDTH]
    h0 = jnp.tanh(jnp.dot(x, w0, preferred_element_type=jnp.float32)
                  + vec("b0", L0_WIDTH))
    hn0 = _bn_train(h0, vec("g0", L0_WIDTH), vec("be0", L0_WIDTH))

    # layer 1: 'final' (its child concat [A, B] is exactly hn0)
    wf = s[WF_ROWS[0]:WF_ROWS[1], 0:FINAL_HIDDEN]
    hf = jnp.tanh(jnp.dot(hn0, wf, preferred_element_type=jnp.float32)
                  + vec("bf", FINAL_HIDDEN))
    hnf = _bn_train(hf, vec("gf", FINAL_HIDDEN), vec("bef", FINAL_HIDDEN))

    # aux head of 'final', lane-padded to 128 cols (cols >= 2 stay exactly 0)
    wa = s[WA_ROWS[0]:WA_ROWS[1], :]
    a = jnp.tanh(jnp.dot(hnf, wa, preferred_element_type=jnp.float32)
                 + vec("ba"))
    out_ref[...] = _bn_train(a, vec("ga"), vec("bea"))


def aop_nn_forward(x, slab):
    """Full AOP_NN_load.forward: returns aux_out_map['final'] of shape (B, 2)."""
    batch = x.shape[0]
    assert batch == BATCH, "slab vector rows are replicated for this batch size"
    vmem = pl.BlockSpec(memory_space=pltpu.MemorySpace.VMEM)  # whole-array blocks

    # Advisory cost hint: tell XLA this custom call is near-zero cost.
    mm = INPUT_DIM * L0_WIDTH + L0_WIDTH * FINAL_HIDDEN + FINAL_HIDDEN * LANE
    ew = L0_WIDTH + FINAL_HIDDEN + LANE
    cost = pl.CostEstimate(
        flops=2 * batch * mm + 10 * batch * ew,
        transcendentals=(batch + 1) * ew,                       # tanh + rsqrt
        bytes_accessed=4 * (batch * INPUT_DIM + SLAB_ROWS * LANE + batch * LANE),
    )

    aux_pad = pl.pallas_call(
        _fused_dag_kernel,
        out_shape=jax.ShapeDtypeStruct((batch, LANE), jnp.float32),
        in_specs=[vmem, vmem],
        out_specs=vmem,
        cost_estimate=cost,
    )(x, slab)
    return aux_pad[:, :2]


# ---------------------------------------------------------------------------
# Parameter init (deterministic, PyTorch-Linear-style uniform bounds),
# and packing of the per-term params into the single kernel slab.
# ---------------------------------------------------------------------------
def init_params(key):
    params = {}
    for layer in TERM_LAYER_LIST:
        for term in layer:
            in_size = sum(TERM_DIM_MAP[c] for c in TERM_NEIGHBOR_MAP[term])
            hidden = TERM_DIM_MAP[term]
            key, k1, k2, k3, k4 = jax.random.split(key, 5)
            bound1 = 1.0 / jnp.sqrt(in_size)
            bound2 = 1.0 / jnp.sqrt(hidden)
            params[term] = {
                "w1": jax.random.uniform(k1, (in_size, hidden), jnp.float32,
                                         -bound1, bound1),
                "b1": jax.random.uniform(k2, (1, hidden), jnp.float32,
                                         -bound1, bound1),
                "g1": jnp.ones((1, hidden), jnp.float32),
                "be1": jnp.zeros((1, hidden), jnp.float32),
                "w2": jax.random.uniform(k3, (hidden, 2), jnp.float32,
                                         -bound2, bound2),
                "b2": jax.random.uniform(k4, (1, 2), jnp.float32,
                                         -bound2, bound2),
                "g2": jnp.ones((1, 2), jnp.float32),
                "be2": jnp.zeros((1, 2), jnp.float32),
            }
    return params, key


def pack_params(params, batch=BATCH):
    """Pack all term params into ONE (SLAB_ROWS, LANE) slab."""
    w = jnp.zeros((SLAB_ROWS, LANE), jnp.float32)

    def set_vec(w, name, row_vec):
        n = row_vec.shape[-1]
        r = VEC_ROW[name]
        rep = jnp.broadcast_to(row_vec.reshape(1, n), (batch, n))
        return w.at[r:r + batch, 0:n].set(rep)

    # layer 0 (A, B) packed side by side; unused input rows stay zero.
    b0 = jnp.zeros((L0_WIDTH,), jnp.float32)
    g0 = jnp.zeros((L0_WIDTH,), jnp.float32)
    be0 = jnp.zeros((L0_WIDTH,), jnp.float32)
    for t in L0_TERMS:
        p = params[t]
        c0, c1 = _l0_col[t]
        ro = 0
        for child in TERM_NEIGHBOR_MAP[t]:
            d = TERM_DIM_MAP[child]
            x0, x1 = _in_off[child]
            w = w.at[W0_ROWS[0] + x0:W0_ROWS[0] + x1, c0:c1].set(
                p["w1"][ro:ro + d])
            ro += d
        b0 = b0.at[c0:c1].set(p["b1"][0])
        g0 = g0.at[c0:c1].set(p["g1"][0])
        be0 = be0.at[c0:c1].set(p["be1"][0])
    w = set_vec(w, "b0", b0)
    w = set_vec(w, "g0", g0)
    w = set_vec(w, "be0", be0)

    # 'final' term (rows placed to match the packed layer-0 column order).
    p = params["final"]
    ro = 0
    for child in TERM_NEIGHBOR_MAP["final"]:
        d = TERM_DIM_MAP[child]
        c0, c1 = _l0_col[child]
        w = w.at[WF_ROWS[0] + c0:WF_ROWS[0] + c1, 0:FINAL_HIDDEN].set(
            p["w1"][ro:ro + d])
        ro += d
    w = set_vec(w, "bf", p["b1"][0])
    w = set_vec(w, "gf", p["g1"][0])
    w = set_vec(w, "bef", p["be1"][0])

    # aux head of 'final': zero-padded to LANE columns -> lane-dense store.
    w = w.at[WA_ROWS[0]:WA_ROWS[1], 0:2].set(p["w2"])
    w = set_vec(w, "ba", p["b2"][0])
    w = set_vec(w, "ga", p["g2"][0])
    w = set_vec(w, "bea", p["be2"][0])

    # Defensive check: padded aux lanes (cols >= 2) of W2/b2/gamma2/beta2 must
    # be exactly zero, otherwise BN of a zero-variance padded column would
    # produce rsqrt(eps)-scaled garbage instead of 0.
    pad_ok = (jnp.all(w[WA_ROWS[0]:WA_ROWS[1], 2:] == 0.0)
              & jnp.all(w[VEC_ROW["ba"]:VEC_ROW["ba"] + 3 * batch, 2:] == 0.0))
    assert bool(pad_ok), "aux-head padding columns must be zero"
    return w


# ---------------------------------------------------------------------------
# Pure-JAX reference (unfused, same math as the torch module) for correctness.
# ---------------------------------------------------------------------------
def _bn_ref(x, g, b):
    mu = jnp.mean(x, axis=0, keepdims=True)
    var = jnp.mean((x - mu) ** 2, axis=0, keepdims=True)
    return (x - mu) * jax.lax.rsqrt(var + BN_EPS) * g + b


def reference_forward(x, params):
    term_out = {}
    m = 0
    for e in LAYERS_DELETE:
        d = TERM_DIM_MAP[e]
        term_out[e] = x[:, m:m + d]
        m += d
    aux_out = {}
    for layer in TERM_LAYER_LIST:
        for term in layer:
            p = params[term]
            ci = jnp.concatenate([term_out[c] for c in TERM_NEIGHBOR_MAP[term]], 1)
            h = jnp.tanh(ci @ p["w1"] + p["b1"])
            hn = _bn_ref(h, p["g1"], p["be1"])
            term_out[term] = hn
            a = jnp.tanh(hn @ p["w2"] + p["b2"])
            aux_out[term] = _bn_ref(a, p["g2"], p["be2"])
    return aux_out["final"]


if __name__ == "__main__":
    key = jax.random.PRNGKey(0)
    params, key = init_params(key)
    key, xk = jax.random.split(key)

    x = jax.random.normal(xk, (BATCH, INPUT_DIM), dtype=jnp.float32)

    slab = pack_params(params)
    forward = jax.jit(aop_nn_forward)        # reuse the compiled call to amortize
    y = jax.block_until_ready(forward(x, slab))

    y_ref = reference_forward(x, params)
    assert y.shape == (BATCH, 2), y.shape
    assert jnp.allclose(y, y_ref, atol=1e-4, rtol=1e-4), (y, y_ref)

    print("KERNEL_OK")
</pallas_src>

<mosaic_0001>
module attributes {stable_mosaic.version = 11 : i64} {
  func.func @_fused_dag_kernel(%arg0: memref<8x16xf32, #tpu.memory_space<vmem>>, %arg1: memref<120x128xf32, #tpu.memory_space<vmem>>, %arg2: memref<8x128xf32, #tpu.memory_space<vmem>>) attributes {dimension_semantics = [], scalar_prefetch = 0 : i64, scratch_operands = 0 : i64, tpu.core_type = #tpu.core_type<tc>} {
    %c0 = arith.constant 0 : index
    %c0_0 = arith.constant 0 : index
    %0 = vector.load %arg0[%c0, %c0_0] : memref<8x16xf32, #tpu.memory_space<vmem>>, vector<8x16xf32>
    %c0_1 = arith.constant 0 : index
    %c0_2 = arith.constant 0 : index
    %1 = vector.load %arg1[%c0_1, %c0_2] : memref<120x128xf32, #tpu.memory_space<vmem>>, vector<120x128xf32>
    %2 = vector.extract_strided_slice %1 {offsets = [0, 0], sizes = [16, 24], strides = [1, 1]} : vector<120x128xf32> to vector<16x24xf32>
    %cst = arith.constant dense<0.000000e+00> : vector<8x24xf32>
    %3 = tpu.matmul %0, %2, %cst {dimension_numbers = #tpu.dot_dimension_numbers<[1], [0], [0], [1], [0, 0, 1, 1], [], []>} : vector<8x16xf32>, vector<16x24xf32>, vector<8x24xf32> -> vector<8x24xf32>
    %4 = vector.extract_strided_slice %1 {offsets = [48, 0], sizes = [8, 24], strides = [1, 1]} : vector<120x128xf32> to vector<8x24xf32>
    %5 = arith.addf %3, %4 : vector<8x24xf32>
    %6 = math.tanh %5 : vector<8x24xf32>
    %7 = vector.extract_strided_slice %1 {offsets = [56, 0], sizes = [8, 24], strides = [1, 1]} : vector<120x128xf32> to vector<8x24xf32>
    %8 = vector.extract_strided_slice %1 {offsets = [64, 0], sizes = [8, 24], strides = [1, 1]} : vector<120x128xf32> to vector<8x24xf32>
    %cst_3 = arith.constant dense<0.000000e+00> : vector<24xf32>
    %9 = vector.multi_reduction <add>, %6, %cst_3 [0] : vector<8x24xf32> to vector<24xf32>
    %10 = vector.shape_cast %9 : vector<24xf32> to vector<1x24xf32>
    %cst_4 = arith.constant 8.000000e+00 : f32
    %11 = vector.broadcast %cst_4 : f32 to vector<1x24xf32>
    %12 = arith.divf %10, %11 : vector<1x24xf32>
    %13 = vector.broadcast %12 : vector<1x24xf32> to vector<8x24xf32>
    %14 = arith.subf %6, %13 : vector<8x24xf32>
    %15 = arith.mulf %14, %14 : vector<8x24xf32>
    %cst_5 = arith.constant dense<0.000000e+00> : vector<24xf32>
    %16 = vector.multi_reduction <add>, %15, %cst_5 [0] : vector<8x24xf32> to vector<24xf32>
    %17 = vector.shape_cast %16 : vector<24xf32> to vector<1x24xf32>
    %cst_6 = arith.constant 8.000000e+00 : f32
    %18 = vector.broadcast %cst_6 : f32 to vector<1x24xf32>
    %19 = arith.divf %17, %18 : vector<1x24xf32>
    %cst_7 = arith.constant 9.99999974E-6 : f32
    %20 = vector.broadcast %cst_7 : f32 to vector<1x24xf32>
    %21 = arith.addf %19, %20 : vector<1x24xf32>
    %22 = math.rsqrt %21 : vector<1x24xf32>
    %23 = vector.broadcast %22 : vector<1x24xf32> to vector<8x24xf32>
    %24 = arith.mulf %14, %23 : vector<8x24xf32>
    %25 = arith.mulf %24, %7 : vector<8x24xf32>
    %26 = arith.addf %25, %8 : vector<8x24xf32>
    %27 = vector.extract_strided_slice %1 {offsets = [16, 0], sizes = [24, 8], strides = [1, 1]} : vector<120x128xf32> to vector<24x8xf32>
    %cst_8 = arith.constant dense<0.000000e+00> : vector<8x8xf32>
    %28 = tpu.matmul %26, %27, %cst_8 {dimension_numbers = #tpu.dot_dimension_numbers<[1], [0], [0], [1], [0, 0, 1, 1], [], []>} : vector<8x24xf32>, vector<24x8xf32>, vector<8x8xf32> -> vector<8x8xf32>
    %29 = vector.extract_strided_slice %1 {offsets = [72, 0], sizes = [8, 8], strides = [1, 1]} : vector<120x128xf32> to vector<8x8xf32>
    %30 = arith.addf %28, %29 : vector<8x8xf32>
    %31 = math.tanh %30 : vector<8x8xf32>
    %32 = vector.extract_strided_slice %1 {offsets = [80, 0], sizes = [8, 8], strides = [1, 1]} : vector<120x128xf32> to vector<8x8xf32>
    %33 = vector.extract_strided_slice %1 {offsets = [88, 0], sizes = [8, 8], strides = [1, 1]} : vector<120x128xf32> to vector<8x8xf32>
    %cst_9 = arith.constant dense<0.000000e+00> : vector<8xf32>
    %34 = vector.multi_reduction <add>, %31, %cst_9 [0] : vector<8x8xf32> to vector<8xf32>
    %35 = vector.shape_cast %34 : vector<8xf32> to vector<1x8xf32>
    %cst_10 = arith.constant 8.000000e+00 : f32
    %36 = vector.broadcast %cst_10 : f32 to vector<1x8xf32>
    %37 = arith.divf %35, %36 : vector<1x8xf32>
    %38 = vector.broadcast %37 : vector<1x8xf32> to vector<8x8xf32>
    %39 = arith.subf %31, %38 : vector<8x8xf32>
    %40 = arith.mulf %39, %39 : vector<8x8xf32>
    %cst_11 = arith.constant dense<0.000000e+00> : vector<8xf32>
    %41 = vector.multi_reduction <add>, %40, %cst_11 [0] : vector<8x8xf32> to vector<8xf32>
    %42 = vector.shape_cast %41 : vector<8xf32> to vector<1x8xf32>
    %cst_12 = arith.constant 8.000000e+00 : f32
    %43 = vector.broadcast %cst_12 : f32 to vector<1x8xf32>
    %44 = arith.divf %42, %43 : vector<1x8xf32>
    %cst_13 = arith.constant 9.99999974E-6 : f32
    %45 = vector.broadcast %cst_13 : f32 to vector<1x8xf32>
    %46 = arith.addf %44, %45 : vector<1x8xf32>
    %47 = math.rsqrt %46 : vector<1x8xf32>
    %48 = vector.broadcast %47 : vector<1x8xf32> to vector<8x8xf32>
    %49 = arith.mulf %39, %48 : vector<8x8xf32>
    %50 = arith.mulf %49, %32 : vector<8x8xf32>
    %51 = arith.addf %50, %33 : vector<8x8xf32>
    %52 = vector.extract_strided_slice %1 {offsets = [40, 0], sizes = [8, 128], strides = [1, 1]} : vector<120x128xf32> to vector<8x128xf32>
    %cst_14 = arith.constant dense<0.000000e+00> : vector<8x128xf32>
    %53 = tpu.matmul %51, %52, %cst_14 {dimension_numbers = #tpu.dot_dimension_numbers<[1], [0], [0], [1], [0, 0, 1, 1], [], []>} : vector<8x8xf32>, vector<8x128xf32>, vector<8x128xf32> -> vector<8x128xf32>
    %54 = vector.extract_strided_slice %1 {offsets = [96, 0], sizes = [8, 128], strides = [1, 1]} : vector<120x128xf32> to vector<8x128xf32>
    %55 = arith.addf %53, %54 : vector<8x128xf32>
    %56 = math.tanh %55 : vector<8x128xf32>
    %57 = vector.extract_strided_slice %1 {offsets = [104, 0], sizes = [8, 128], strides = [1, 1]} : vector<120x128xf32> to vector<8x128xf32>
    %58 = vector.extract_strided_slice %1 {offsets = [112, 0], sizes = [8, 128], strides = [1, 1]} : vector<120x128xf32> to vector<8x128xf32>
    %cst_15 = arith.constant dense<0.000000e+00> : vector<128xf32>
    %59 = vector.multi_reduction <add>, %56, %cst_15 [0] : vector<8x128xf32> to vector<128xf32>
    %60 = vector.shape_cast %59 : vector<128xf32> to vector<1x128xf32>
    %cst_16 = arith.constant 8.000000e+00 : f32
    %61 = vector.broadcast %cst_16 : f32 to vector<1x128xf32>
    %62 = arith.divf %60, %61 : vector<1x128xf32>
    %63 = vector.broadcast %62 : vector<1x128xf32> to vector<8x128xf32>
    %64 = arith.subf %56, %63 : vector<8x128xf32>
    %65 = arith.mulf %64, %64 : vector<8x128xf32>
    %cst_17 = arith.constant dense<0.000000e+00> : vector<128xf32>
    %66 = vector.multi_reduction <add>, %65, %cst_17 [0] : vector<8x128xf32> to vector<128xf32>
    %67 = vector.shape_cast %66 : vector<128xf32> to vector<1x128xf32>
    %cst_18 = arith.constant 8.000000e+00 : f32
    %68 = vector.broadcast %cst_18 : f32 to vector<1x128xf32>
    %69 = arith.divf %67, %68 : vector<1x128xf32>
    %cst_19 = arith.constant 9.99999974E-6 : f32
    %70 = vector.broadcast %cst_19 : f32 to vector<1x128xf32>
    %71 = arith.addf %69, %70 : vector<1x128xf32>
    %72 = math.rsqrt %71 : vector<1x128xf32>
    %73 = vector.broadcast %72 : vector<1x128xf32> to vector<8x128xf32>
    %74 = arith.mulf %64, %73 : vector<8x128xf32>
    %75 = arith.mulf %74, %57 : vector<8x128xf32>
    %76 = arith.addf %75, %58 : vector<8x128xf32>
    %c0_20 = arith.constant 0 : index
    %c0_21 = arith.constant 0 : index
    %77 = vector.load %arg2[%c0_20, %c0_21] : memref<8x128xf32, #tpu.memory_space<vmem>>, vector<8x128xf32>
    tpu.vector_store %arg2[%c0_20, %c0_21], %76 {strides = array<i32>} : memref<8x128xf32, #tpu.memory_space<vmem>>, vector<8x128xf32>,
    return
  }
}

</mosaic_0001>

<bundles_post_ra>
// kernel: aop_nn_forward.1
= control target key start
LH: loop header
LB: loop body
LE: loop exit
PB: predicated region body
PF: predicated region fallthrough
CT: control target
= control target key end

     0   :  { %7 = vsyncpa [#allocation3], 0  ;;  %s521_s0 = inlined_call_operand.hbm [shape: f32[8,16], index: 0, kind: input, shape index: {}]   ;;  %s522_s1 = inlined_call_operand.hbm [shape: f32[120,128], index: 1, kind: input, shape index: {}]   ;;  %s523_s2 = inlined_call_operand.vmem [shape: f32[8,128], index: 2, kind: output, shape index: {}]  }
   0x1   :  { %8 = vsyncpa [#allocation5], 0  ;;  %s459_s9 = smov [#allocation2]   ;;  %s460_s11 = smov [#allocation4]  }
   0x2   :  { %s15_s10 = sshll.u32 %s459_s9, 4  ;;  %s24_s12 = sshll.u32 %s460_s11, 4  ;;  %s16_s10 = int_to_ptr.vmem [resolvable:$true] %s15_s10  ;;  %s481_s12 = int_to_ptr.vmem [resolvable:$true] %s24_s12 }
   0x3   :  { %s411_s15 = scalar_lea.hbm %s521_s0, 128 }
   0x4   :  { %p412_p0 = scmp.ne.s32.totalorder %s521_s0, %s411_s15  ;;  %p415_p1 = scmp.lt.u32.totalorder %s411_s15, %s521_s0 }
   0x6   :  { %p417_p2 = pnand %p415_p1, %p412_p0 }
   0x8   :  { %420 = shalt.err (!%p417_p2)
}
   0x9   :  { %s421_s20 = scalar_lea.vmem %s16_s10, 128  ;;  %p426_p4 = scmp.lt.s32.totalorder %s16_s10, %s16_s10 }
   0xa   :  { %p422_p3 = scmp.ne.s32.totalorder %s16_s10, %s421_s20  ;;  %p427_p5 = scmp.lt.s32.totalorder %s421_s20, %s421_s20 }
   0xc   :  { %p428_p6 = por %p427_p5, %p426_p4 }
   0xe   :  { %p429_p7 = pnand %p428_p6, %p422_p3 }
  0x10   :  { %432 = shalt.err (!%p429_p7)
}
  0x11   :  { %18 = dma.hbm_to_vmem [thread:$0]  %s521_s0, 128, %s16_s10, [#allocation3]  }
  0x12   :  { %s433_s25 = scalar_lea.hbm %s522_s1, 1920 }
  0x13   :  { %p434_p8 = scmp.ne.s32.totalorder %s522_s1, %s433_s25  ;;  %p437_p9 = scmp.lt.u32.totalorder %s433_s25, %s522_s1 }
  0x15   :  { %p439_p10 = pnand %p437_p9, %p434_p8 }
  0x17   :  { %442 = shalt.err (!%p439_p10)
}
  0x18   :  { %s443_s30 = scalar_lea.vmem %s481_s12, 1920  ;;  %p448_p12 = scmp.lt.s32.totalorder %s481_s12, %s481_s12 }
  0x19   :  { %p444_p11 = scmp.ne.s32.totalorder %s481_s12, %s443_s30  ;;  %p449_p13 = scmp.lt.s32.totalorder %s443_s30, %s443_s30 }
  0x1b   :  { %p450_p0 = por %p449_p13, %p448_p12 }
  0x1d   :  { %p451_p1 = pnand %p450_p0, %p444_p11 }
  0x1f   :  { %454 = shalt.err (!%p451_p1)
}
  0x20   :  { %s461_s0 = smov 128   ;;  %s462_s3 = smov 8  }
  0x21   :  { %30 = dma.hbm_to_vmem [thread:$0]  %s522_s1, 1920, %s481_s12, [#allocation5], %s461_s0, %s461_s0, %s462_s3  }
  0x22   :  { %455 = dma.done.wait [#allocation3], 128  }
  0x23   :  { %456 = vsyncadd [#allocation3], 4294967168 }
  0x24   :  { %457 = dma.done.wait [#allocation5], 1920  }
  0x25   :  { %458 = vsyncadd [#allocation5], 4294965376  ;;  %v463_v0 = vmov 0.0|0.0   ;;  %vm464_vm0 = vmmov 0   ;;  %v465_v1 = vmov 0.0   ;;  %v38_v2 = vld [vmem:[#allocation4] sm:$0xff] }
  0x26   :  { %386 = vmatprep.subr.bf16.mxu0 %v463_v0  ;;  %369 = vmatprep.mubr.msk.f32.mxu0 %vm464_vm0, %v465_v1  ;;  %v39_v3 = vld [vmem:[#allocation4 + $0x8] sm:$0xff]  ;;  %v37_v5 = vld [vmem:[#allocation2] sm:$0xff]  ;;  %vm53_vm1 = vcmask 130048   ;;  %v40_v6 = vld [vmem:[#allocation4 + $0x10] sm:$0xff]  ;;  %vm128_vm2 = vcmask 195584   ;;  %vm227_vm3 = vcmask 64512  }
  0x27   :  { %389 = vmatprep.subr.bf16.mxu1 %v463_v0  ;;  %378 = vmatprep.mubr.msk.f32.mxu1 %vm464_vm0, %v465_v1  ;;  %v387_v4 = vpack.c.bf16 %v39_v3, %v38_v2  ;;  %v41_v7 = vld [vmem:[#allocation4 + $0x18] sm:$0xff]  ;;  %v42_v9 = vld [vmem:[#allocation4 + $0x20] sm:$0xff]  ;;  %v44_v10 = vld [vmem:[#allocation4 + $0x30] sm:$0xff] }
  0x28   :  { %v390_v8 = vpack.c.bf16 %v41_v7, %v40_v6  ;;  %v45_v35 = vld [vmem:[#allocation4 + $0x38] sm:$0xff]  ;;  %v46_v37 = vld [vmem:[#allocation4 + $0x40] sm:$0xff]  ;;  %v43_v40 = vld [vmem:[#allocation4 + $0x28] sm:$0xff] }
  0x29   :  { %388 = vmatpush3.bf16.msra.mxu0 %v387_v4  ;;  %v47_v41 = vld [vmem:[#allocation4 + $0x48] sm:$0xff]  ;;  %v48_v2 = vld [vmem:[#allocation4 + $0x50] sm:$0xff]  ;;  %v49_v4 = vld [vmem:[#allocation4 + $0x58] sm:$0xff] }
  0x2a   :  { %381 = vmatprep.subr.mxu0 %v465_v1  ;;  %391 = vmatpush3.bf16.msra.mxu1 %v390_v8  ;;  %v50_v7 = vld [vmem:[#allocation4 + $0x60] sm:$0xff] }
  0x2b   :  { %376 = vmatprep.subr.mxu1 %v465_v1 }
  0x2c   :  { %370 = vmatmul.mubr.msk.f32.vlgmr.msra.gmra.mrb[0].mxu0 %vm53_vm1, %v37_v5 }
  0x2d   :  { %383 = vmatprep.mubr.msk.f32.mxu0 %vm464_vm0, %v465_v1  ;;  %382 = vmatpush3.msra.mxu0 %v43_v40 }
  0x2e   :  { %377 = vmatpush3.msra.mxu1 %v42_v9 }
  0xff   :  { %v123_v11 = vpop.f32.mrb[0].mxu0 }
 0x100   :  { %v124_v12 = vadd.f32 %v123_v11, %v44_v10  ;;  %v371_v13 = vpop.f32.mrb[1].mxu0 }
 0x102   :  { %399 = vtanh.f32 %v124_v12 }
 0x10c   :  { %v400_v14 = vpop.eup %399 }
 0x10d   :  { %v129_v15 = vsel %vm128_vm2, %v400_v14, 0.0 }
 0x10e   :  { %v130_v16 = vrot.slane %v129_v15, 4 }
 0x110   :  { %v131_v17 = vadd.f32 %v130_v16, %v129_v15 }
 0x112   :  { %v132_v18 = vrot.slane %v131_v17, 2 }
 0x114   :  { %v133_v19 = vadd.f32 %v132_v18, %v131_v17 }
 0x116   :  { %v134_v20 = vrot.slane %v133_v19, 1 }
 0x118   :  { %v135_v21 = vadd.f32 %v134_v20, %v133_v19 }
 0x11a   :  { %v137_v22 = vmul.f32 0.125, %v135_v21 }
 0x11c   :  { %v138_v23 = vsub.f32 %v400_v14, %v137_v22 }
 0x11e   :  { %v139_v24 = vmul.f32 %v138_v23, %v138_v23 }
 0x120   :  { %v140_v25 = vsel %vm128_vm2, %v139_v24, 0.0 }
 0x121   :  { %v141_v26 = vrot.slane %v140_v25, 4 }
 0x123   :  { %v142_v27 = vadd.f32 %v141_v26, %v140_v25 }
 0x125   :  { %v143_v28 = vrot.slane %v142_v27, 2 }
 0x127   :  { %v144_v29 = vadd.f32 %v143_v28, %v142_v27 }
 0x129   :  { %v145_v30 = vrot.slane %v144_v29, 1 }
 0x12b   :  { %v146_v31 = vadd.f32 %v145_v30, %v144_v29  ;;  %v51_v30 = vld [vmem:[#allocation4 + $0x68] sm:$0xff] }
 0x12d   :  { %v147_v32 = vmul.f32 0.125, %v146_v31 }
 0x12f   :  { %v148_v33 = vadd.f32 1e-05, %v147_v32  ;;  %v52_v32 = vld [vmem:[#allocation4 + $0x70] sm:$0xff] }
 0x131   :  { %401 = vrsqrt.f32 %v148_v33 }
 0x13b   :  { %v402_v34 = vpop.eup %401 }
 0x13c   :  { %v150_v36 = vmul.f32 %v402_v34, %v138_v23 }
 0x13e   :  { %v151_v38 = vmul.f32 %v150_v36, %v45_v35 }
 0x140   :  { %v152_v39 = vadd.f32 %v151_v38, %v46_v37 }
 0x142   :  { %379 = vmatmul.mubr.msk.f32.vlgmr.msra.gmra.mrb[0].mxu1 %vm128_vm2, %v152_v39 }
 0x215   :  { %v222_v42 = vpop.f32.mrb[0].mxu1 }
 0x216   :  { %v223_v43 = vadd.f32 %v222_v42, %v47_v41  ;;  %v380_v44 = vpop.f32.mrb[1].mxu1 }
 0x218   :  { %403 = vtanh.f32 %v223_v43 }
 0x222   :  { %v404_v45 = vpop.eup %403 }
 0x223   :  { %v228_v46 = vsel %vm227_vm3, %v404_v45, 0.0 }
 0x224   :  { %v229_v47 = vrot.slane %v228_v46, 4 }
 0x226   :  { %v230_v48 = vadd.f32 %v229_v47, %v228_v46 }
 0x228   :  { %v231_v49 = vrot.slane %v230_v48, 2 }
 0x22a   :  { %v232_v50 = vadd.f32 %v231_v49, %v230_v48 }
 0x22c   :  { %v233_v51 = vrot.slane %v232_v50, 1 }
 0x22e   :  { %v234_v52 = vadd.f32 %v233_v51, %v232_v50 }
 0x230   :  { %v235_v53 = vmul.f32 0.125, %v234_v52 }
 0x232   :  { %v236_v54 = vsub.f32 %v404_v45, %v235_v53 }
 0x234   :  { %v237_v55 = vmul.f32 %v236_v54, %v236_v54 }
 0x236   :  { %v238_v56 = vsel %vm227_vm3, %v237_v55, 0.0 }
 0x237   :  { %v239_v57 = vrot.slane %v238_v56, 4 }
 0x239   :  { %v240_v58 = vadd.f32 %v239_v57, %v238_v56 }
 0x23b   :  { %v241_v59 = vrot.slane %v240_v58, 2 }
 0x23d   :  { %v242_v60 = vadd.f32 %v241_v59, %v240_v58 }
 0x23f   :  { %v243_v61 = vrot.slane %v242_v60, 1 }
 0x241   :  { %v244_v62 = vadd.f32 %v243_v61, %v242_v60 }
 0x243   :  { %v245_v63 = vmul.f32 0.125, %v244_v62 }
 0x245   :  { %v246_v0 = vadd.f32 1e-05, %v245_v63 }
 0x247   :  { %405 = vrsqrt.f32 %v246_v0 }
 0x251   :  { %v406_v1 = vpop.eup %405 }
 0x252   :  { %v248_v3 = vmul.f32 %v406_v1, %v236_v54 }
 0x254   :  { %v249_v5 = vmul.f32 %v248_v3, %v48_v2 }
 0x256   :  { %v250_v6 = vadd.f32 %v249_v5, %v49_v4 }
 0x258   :  { %384 = vmatmul.mubr.msk.f32.vlgmr.msra.gmra.mrb[2].mxu0 %vm227_vm3, %v250_v6 }
 0x32b   :  { %v320_v8 = vpop.f32.mrb[2].mxu0 }
 0x32c   :  { %v321_v9 = vadd.f32 %v320_v8, %v50_v7  ;;  %v385_v10 = vpop.f32.mrb[3].mxu0 }
 0x32e   :  { %407 = vtanh.f32 %v321_v9 }
 0x338   :  { %v408_v11 = vpop.eup %407 }
 0x339   :  { %v325_v12 = vrot.slane %v408_v11, 4 }
 0x33b   :  { %v326_v13 = vadd.f32 %v408_v11, %v325_v12 }
 0x33d   :  { %v327_v14 = vrot.slane %v326_v13, 2 }
 0x33f   :  { %v328_v15 = vadd.f32 %v327_v14, %v326_v13 }
 0x341   :  { %v329_v16 = vrot.slane %v328_v15, 1 }
 0x343   :  { %v330_v17 = vadd.f32 %v329_v16, %v328_v15 }
 0x345   :  { %v331_v18 = vmul.f32 0.125, %v330_v17 }
 0x347   :  { %v332_v19 = vsub.f32 %v408_v11, %v331_v18 }
 0x349   :  { %v333_v20 = vmul.f32 %v332_v19, %v332_v19 }
 0x34b   :  { %v334_v21 = vrot.slane %v333_v20, 4 }
 0x34d   :  { %v335_v22 = vadd.f32 %v334_v21, %v333_v20 }
 0x34f   :  { %v336_v23 = vrot.slane %v335_v22, 2 }
 0x351   :  { %v337_v24 = vadd.f32 %v336_v23, %v335_v22 }
 0x353   :  { %v338_v25 = vrot.slane %v337_v24, 1 }
 0x355   :  { %v339_v26 = vadd.f32 %v338_v25, %v337_v24 }
 0x357   :  { %v340_v27 = vmul.f32 0.125, %v339_v26 }
 0x359   :  { %v341_v28 = vadd.f32 1e-05, %v340_v27 }
 0x35b   :  { %409 = vrsqrt.f32 %v341_v28 }
 0x365   :  { %v410_v29 = vpop.eup %409 }
 0x366   :  { %v343_v31 = vmul.f32 %v410_v29, %v332_v19 }
 0x368   :  { %v344_v33 = vmul.f32 %v343_v31, %v51_v30 }
 0x36a   :  { %v345_v34 = vadd.f32 %v344_v33, %v52_v32 }
 0x36c   :  { %346 = vst [vmem:[%s523_s2] sm:$0xff] %v345_v34 }
 0x36d   :  { %351 = vsyncpa [#allocation3], 1 }
 0x36e   :  { %352 = vsyncpa [#allocation5], 1 }

</bundles_post_ra>
